<compile_context>
chip_gen: v7x
topology: tpu7x:2x2x1
jax: 0.10.0
libtpu: 0.0.40
codegen_flags: <defaults>
</compile_context>

<pallas_src>
import math

import jax
import jax.numpy as jnp
from jax.experimental import pallas as pl
from jax.experimental.pallas import tpu as pltpu

_LANE = 128


def _concat_kernel(*refs):
    """refs = (obs_ref_0, ..., obs_ref_{n-1}, out_ref).

    Dtype promotion happens in-register (VPU has huge slack in a memory-bound
    kernel); the whole (tb, total) slab is written with a single lane-dense
    store, reproducing torch.cat(obs_list, dim=-1).
    """
    out_ref = refs[-1]
    in_refs = refs[:-1]
    if len(in_refs) == 1:
        out_ref[...] = in_refs[0][...].astype(out_ref.dtype)
    else:
        out_ref[...] = jnp.concatenate(
            [r[...].astype(out_ref.dtype) for r in in_refs], axis=-1
        )


def _round_up(x, m):
    return ((x + m - 1) // m) * m


def _sublane_multiple(dtype):
    itemsize = jnp.dtype(dtype).itemsize
    if itemsize >= 4:
        return 8
    if itemsize == 2:
        return 16
    return 32


def _vmem_budgets():
    """Return (tile_budget_bytes, vmem_limit_bytes), generation-aware."""
    try:
        cap = pltpu.get_tpu_info().vmem_capacity_bytes
    except Exception:
        cap = 64 * 1024 * 1024  # conservative (v7x-sized) fallback
    if cap >= 100 * 1024 * 1024:            # v5e / v6e: 128 MiB physical VMEM
        return 32 * 1024 * 1024, 96 * 1024 * 1024
    return 20 * 1024 * 1024, 48 * 1024 * 1024  # v7x: 64 MiB physical VMEM


def _choose_batch_tile(batch, in_dims, in_dtypes, total, out_dtype,
                       tile_budget, max_rows_override=None):
    """Largest batch tile (multiple of the dtype sublane tile, or == full batch)
    whose *physical* (lane-padded, double-buffered) VMEM footprint fits."""
    out_row = _round_up(total, _LANE) * jnp.dtype(out_dtype).itemsize
    in_row = sum(
        _round_up(d, _LANE) * jnp.dtype(dt).itemsize
        for d, dt in zip(in_dims, in_dtypes)
    )
    # 2x double-buffered inputs + 2x double-buffered output + 1x concat temp.
    bytes_per_row = 2 * in_row + 3 * out_row
    max_rows = max(1, tile_budget // max(1, bytes_per_row))
    if max_rows_override is not None:
        max_rows = min(max_rows, max_rows_override)
    if batch <= max_rows:
        return batch  # full-extent batch block: always legal regardless of multiple
    sub = max(_sublane_multiple(dt) for dt in list(in_dtypes) + [out_dtype])
    tb = (max_rows // sub) * sub
    return max(tb, sub)


class ModelBaseSimpleRep:
    """JAX/Pallas port.  obs_shapes: list of per-obs shapes, e.g. [(6,), (8,)]."""

    _MIN_TOTAL_FOR_KERNEL = 256   # below this a fused XLA concat always wins
    _MIN_BATCH_FOR_KERNEL = 16

    def __init__(self, obs_shapes, max_tile_rows=None):
        self.obs_shapes = [tuple(s) for s in obs_shapes]
        self._max_tile_rows = max_tile_rows  # testing hook: force a multi-step grid
        self._bulid_model()

    def _bulid_model(self):
        # Base class builds no parameters.
        pass

    def get_output_shape(self):
        # Analytical: no Pallas compile / device round trip at construction time.
        return sum(math.prod(s) for s in self.obs_shapes)

    def __call__(self, obs_list):
        return self.forward(obs_list)

    def forward(self, obs_list):
        # Flatten any trailing dims into a single feature dim (vector obs).
        flat = [o.reshape(o.shape[0], -1) for o in obs_list]
        batch = flat[0].shape[0]
        dims = [o.shape[-1] for o in flat]
        in_dtypes = [o.dtype for o in flat]
        total = sum(dims)
        out_dtype = jnp.result_type(*in_dtypes)

        # Fast path 1: single input, no cast needed -> pure metadata op.
        if len(flat) == 1 and flat[0].dtype == out_dtype:
            return flat[0]

        # Fast path 2: tiny slab / tiny batch -> let XLA fuse the concat into
        # the downstream consumer (a standalone kernel can never win here).
        if total < self._MIN_TOTAL_FOR_KERNEL or batch < self._MIN_BATCH_FOR_KERNEL:
            return jnp.concatenate([o.astype(out_dtype) for o in flat], axis=-1)

        tile_budget, vmem_limit = _vmem_budgets()
        tb = _choose_batch_tile(batch, dims, in_dtypes, total, out_dtype,
                                tile_budget, self._max_tile_rows)
        grid = (pl.cdiv(batch, tb),)

        # Blocks: (tb, D_i) per input / (tb, total) output.  Last dim is the full
        # array extent (legal regardless of 128-alignment); tb is either the full
        # batch or a multiple of the dtype-aware sublane tile.
        in_specs = [pl.BlockSpec((tb, d), lambda i: (i, 0)) for d in dims]
        out_spec = pl.BlockSpec((tb, total), lambda i: (i, 0))

        in_bytes = sum(batch * d * jnp.dtype(dt).itemsize
                       for d, dt in zip(dims, in_dtypes))
        out_bytes = batch * total * jnp.dtype(out_dtype).itemsize
        cost = pl.CostEstimate(flops=0, transcendentals=0,
                               bytes_accessed=in_bytes + out_bytes)

        return pl.pallas_call(
            _concat_kernel,
            out_shape=jax.ShapeDtypeStruct((batch, total), out_dtype),
            grid=grid,
            in_specs=in_specs,
            out_specs=out_spec,
            compiler_params=pltpu.CompilerParams(
                dimension_semantics=("parallel",),  # batch axis is independent
                vmem_limit_bytes=vmem_limit,
            ),
            cost_estimate=cost,
        )(*flat)


if __name__ == "__main__":
    key = jax.random.PRNGKey(0)
    keys = jax.random.split(key, 4)

    # --- Case 1: Pallas kernel path (multi-step grid, partial final tile,
    # mixed-dtype in-kernel cast). dims 128 + 192 + 300 = 620. ---
    obs_shapes = [(128,), (6, 32), (300,)]
    batch = 80
    obs_list = [
        jax.random.normal(keys[0], (batch, 128), dtype=jnp.float32),
        jax.random.normal(keys[1], (batch, 6, 32), dtype=jnp.bfloat16),
        jax.random.normal(keys[2], (batch, 300), dtype=jnp.float32),
    ]
    model = ModelBaseSimpleRep(obs_shapes, max_tile_rows=32)  # force grid=(3,) for test
    out = jax.block_until_ready(model(obs_list))

    ref = jnp.concatenate(
        [o.reshape(batch, -1).astype(jnp.float32) for o in obs_list], axis=-1)
    assert out.shape == (batch, 620) and out.dtype == jnp.float32
    assert jnp.allclose(out, ref), "pallas concat mismatch vs reference"
    assert model.get_output_shape() == 620

    # --- Case 2: tiny shapes -> fused-concat fast path. ---
    small_shapes = [(6,), (8,), (10,)]
    small_model = ModelBaseSimpleRep(small_shapes)
    small_obs = [
        jax.random.normal(k, (2,) + s, dtype=jnp.float32)
        for k, s in zip(jax.random.split(keys[3], 3), small_shapes)
    ]
    small_out = jax.block_until_ready(small_model(small_obs))
    small_ref = jnp.concatenate([o.reshape(2, -1) for o in small_obs], axis=-1)
    assert small_out.shape == (2, 24)
    assert jnp.allclose(small_out, small_ref)
    assert small_model.get_output_shape() == 24

    print("KERNEL_OK")
</pallas_src>

<mosaic_0001>
module attributes {stable_mosaic.version = 11 : i64} {
  func.func @_concat_kernel(%arg0: i32, %arg1: memref<32x128xf32, #tpu.memory_space<vmem>>, %arg2: memref<32x192xbf16, #tpu.memory_space<vmem>>, %arg3: memref<32x300xf32, #tpu.memory_space<vmem>>, %arg4: memref<32x620xf32, #tpu.memory_space<vmem>>) attributes {dimension_semantics = [#tpu.dimension_semantics<parallel>], iteration_bounds = array<i64: 3>, scalar_prefetch = 0 : i64, scratch_operands = 0 : i64, tpu.core_type = #tpu.core_type<tc>, window_params = [{transform_indices = @transform_0, window_bounds = array<i64: 32, 128>}, {transform_indices = @transform_1, window_bounds = array<i64: 32, 192>}, {transform_indices = @transform_2, window_bounds = array<i64: 32, 300>}, {transform_indices = @transform_3, window_bounds = array<i64: 32, 620>}]} {
    %c0 = arith.constant 0 : index
    %c0_0 = arith.constant 0 : index
    %0 = vector.load %arg1[%c0, %c0_0] : memref<32x128xf32, #tpu.memory_space<vmem>>, vector<32x128xf32>
    %c0_1 = arith.constant 0 : index
    %c0_2 = arith.constant 0 : index
    %1 = vector.load %arg2[%c0_1, %c0_2] : memref<32x192xbf16, #tpu.memory_space<vmem>>, vector<32x192xbf16>
    %2 = arith.extf %1 : vector<32x192xbf16> to vector<32x192xf32>
    %c0_3 = arith.constant 0 : index
    %c0_4 = arith.constant 0 : index
    %3 = vector.load %arg3[%c0_3, %c0_4] : memref<32x300xf32, #tpu.memory_space<vmem>>, vector<32x300xf32>
    %4 = tpu.concatenate %0, %2, %3 in 1 : vector<32x128xf32>, vector<32x192xf32>, vector<32x300xf32> -> vector<32x620xf32>
    %c0_5 = arith.constant 0 : index
    %c0_6 = arith.constant 0 : index
    %5 = vector.load %arg4[%c0_5, %c0_6] : memref<32x620xf32, #tpu.memory_space<vmem>>, vector<32x620xf32>
    tpu.vector_store %arg4[%c0_5, %c0_6], %4 {strides = array<i32>} : memref<32x620xf32, #tpu.memory_space<vmem>>, vector<32x620xf32>,
    return
  }
  func.func @transform_0(%arg0: i32) -> (i32, i32) {
    %c0_i32 = arith.constant 0 : i32
    %c0_i32_0 = arith.constant 0 : i32
    return %arg0, %c0_i32 : i32, i32
  }
  func.func @transform_1(%arg0: i32) -> (i32, i32) {
    %c0_i32 = arith.constant 0 : i32
    %c0_i32_0 = arith.constant 0 : i32
    return %arg0, %c0_i32 : i32, i32
  }
  func.func @transform_2(%arg0: i32) -> (i32, i32) {
    %c0_i32 = arith.constant 0 : i32
    %c0_i32_0 = arith.constant 0 : i32
    return %arg0, %c0_i32 : i32, i32
  }
  func.func @transform_3(%arg0: i32) -> (i32, i32) {
    %c0_i32 = arith.constant 0 : i32
    %c0_i32_0 = arith.constant 0 : i32
    return %arg0, %c0_i32 : i32, i32
  }
}

</mosaic_0001>

<bundles_post_ra>
// kernel: tpu_custom_call.1
= control target key start
LH: loop header
LB: loop body
LE: loop exit
PB: predicated region body
PF: predicated region fallthrough
CT: control target
= control target key end

     0   :  { %8 = vsyncpa [#allocation3], 0  ;;  %s1186_s0 = inlined_call_operand.hbm [shape: f32[80,128], index: 0, kind: input, shape index: {}]   ;;  %s1187_s1 = inlined_call_operand.hbm [shape: bf16[80,192], index: 1, kind: input, shape index: {}]   ;;  %s1188_s2 = inlined_call_operand.hbm [shape: f32[80,300], index: 2, kind: input, shape index: {}]   ;;  %s1189_s3 = inlined_call_operand.hbm [shape: f32[80,620], index: 3, kind: output, shape index: {}]  }
   0x1   :  { %10 = vsyncpa [#allocation3 + $0x1], 0 }
   0x2   :  { %11 = vsyncpa [#allocation6], 0 }
   0x3   :  { %13 = vsyncpa [#allocation6 + $0x1], 0 }
   0x4   :  { %14 = vsyncpa [#allocation4], 0 }
   0x5   :  { %16 = vsyncpa [#allocation4 + $0x1], 0  ;;  %s845_s12 = smov 0   ;;  %s847_s13 = smov 0  }
   0x6   :  { %s849_s14 = smov 0   ;;  %s851_s15 = smov 0  }
   0x7 LB: > { %s866_s16 = sadd.s32 4294967295, %s810_s15   ;;  %s559_s17 = sadd.s32 4294967294, %s810_s15   ;;  %s810_s15 = sphi %s851_s15, %s1199_s15   ;;  %s806_s14 = sphi %s849_s14, %s1198_s14   ;;  %s802_s13 = sphi %s847_s13, %s1197_s13   ;;  %s798_s12 = sphi %s845_s12, %s1196_s12  }
   0x8   : > { %s870_s18 = sadd.s32 1, %s810_s15   ;;  %s29_s19 = sadd.s32 1, %s806_s14 }
   0x9   : > { %s26_s20 = ssub.s32 %s810_s15, %s870_s18  ;;  %p36_p0 = scmp.ne.s32.totalorder %s806_s14, %s802_s13 }
   0xa   : > { %p27_p1 = scmp.eq.s32.totalorder %s26_s20, 0  ;;  %p37_p2 = scmp.eq.s32.totalorder %s810_s15, 0 }
   0xb   : > { %p42_p3 = scmp.ne.s32.totalorder %s802_s13, %s798_s12  ;;  %p43_p4 = scmp.eq.s32.totalorder %s866_s16, 0 }
   0xc   : > { %s882_s21 = scalar_select %p27_p1, %s806_s14, %s29_s19  }
   0xd   : > { %p884_p5 = por %p37_p2, %p36_p0  ;;  %p888_p6 = por %p43_p4, %p42_p3 }
   0xe   : > { %p118_p7 = scmp.eq.s32.totalorder %s866_s16, 2  ;;  %p124_p8 = scmp.eq.s32.totalorder %s559_s17, 2 }
   0xf   : > { %p561_p11 = scmp.ge.s32.totalorder %s810_s15, 3 }
  0x10   : > { %p893_p9 = por %p118_p7, %p36_p0  ;;  %p897_p10 = por %p124_p8, %p42_p3 }
  0x11   : > { %140 = sbr.rel (%p561_p11) target bundleno = 130 (0x82), region = 16 }
  0x12   : > { %s1192_s24 = scalar_select %p893_p9, 1, 0 }
  0x13   : > { %s1193_s25 = scalar_select %p897_p10, 1, 0 }
  0x18   : > { %143 = sbr.rel (!%p884_p5) target bundleno = 59 (0x3b), region = 20  ;;  %s144_s26 = sand.u32 (%p884_p5), 1, %s806_s14  }
  0x19   : > { %s563_s27 = sshll.u32 (%p884_p5), %s810_s15, 2  ;;  %s562_s28 = sshll.u32 (%p884_p5), %s144_s26, 5 }
  0x1a   : > { %s150_s29 = ssub.s32 (%p884_p5), 10, %s563_s27  ;;  %s909_s5 = scalar_lea.sflag (%p884_p5), [#allocation3], %s144_s26 }
  0x1b   : > { %p151_p12 = scmp.lt.s32.totalorder (%p884_p5), %s150_s29, 4  ;;  %s148_s6 = scalar_lea.vmem (%p884_p5), [#allocation2], %s562_s28 }
  0x1f   : > { %s1201_s29 = smov (!%p151_p12, %s150_s29), 4 }
  0x20   : > { %s906_s30 = sshll.u32 %s1201_s29, 7 }
  0x21   : > { %s155_s4 = ssub.s32 512, %s906_s30 }
  0x22   : > { %156 = vsyncadd %s909_s5, %s155_s4  ;;  %p565_p13 = scmp.ne.s32.totalorder %s906_s30, 0  ;;  %s597_s7 = sshll.u32 %s810_s15, 9 }
  0x23   : > { %s917_s10 = scalar_lea.hbm %s1186_s0, %s597_s7  ;;  %s161_s11 = sshll.u32 %s148_s6, 4  ;;  %s919_s11 = int_to_ptr.vmem [resolvable:$true] %s161_s11 }
  0x24   : > { %s656_s17 = scalar_lea.hbm %s917_s10, %s906_s30  ;;  %s660_s26 = scalar_lea.hbm %s1186_s0, 1280 }
  0x25   : > { %p657_p0 = scmp.ne.s32.totalorder %s917_s10, %s656_s17  ;;  %p661_p3 = scmp.lt.u32.totalorder %s917_s10, %s1186_s0 }
  0x26   : > { %p662_p4 = scmp.lt.u32.totalorder %s660_s26, %s656_s17  ;;  %p664_p8 = scmp.lt.u32.totalorder %s656_s17, %s917_s10 }
  0x27   : > { %p658_p1 = pnand %p657_p0, %p565_p13 }
  0x28   : > { %p663_p7 = por %p662_p4, %p661_p3 }
  0x29   : > { %p659_p2 = pneg %p658_p1 }
  0x2a   : > { %p665_p11 = por %p664_p8, %p663_p7 }
  0x2c   : > { %p666_p12 = pnand %p665_p11, %p659_p2 }
  0x2e   : > { %669 = shalt.err (!%p666_p12)
}
  0x2f   : > { %s670_s29 = scalar_lea.vmem %s919_s11, %s906_s30  ;;  %s812_s4 = smov [#allocation2]  }
  0x30   : > { %p671_p0 = scmp.ne.s32.totalorder %s919_s11, %s670_s29  ;;  %s674_s6 = sshll.u32 %s812_s4, 4  ;;  %s675_s6 = int_to_ptr.vmem [resolvable:$false] %s674_s6 }
  0x31   : > { %s676_s7 = scalar_lea.vmem %s675_s6, 1024  ;;  %p677_p9 = scmp.lt.s32.totalorder %s919_s11, %s675_s6 }
  0x32   : > { %p672_p1 = pnand %p671_p0, %p565_p13  ;;  %p678_p3 = scmp.lt.s32.totalorder %s676_s7, %s670_s29 }
  0x34   : > { %p673_p10 = pneg %p672_p1  ;;  %p679_p4 = por %p678_p3, %p677_p9 }
  0x36   : > { %p680_p7 = pnand %p679_p4, %p673_p10 }
  0x38   : > { %683 = shalt.err (!%p680_p7)
}
  0x39   : > { %s813_s8 = smov 128   ;;  %s814_s9 = smov 8  }
  0x3a   : > { %167 = dma.hbm_to_vmem [thread:$0]  (%p565_p13), %s917_s10, %s906_s30, %s919_s11, %s909_s5, %s813_s8, %s813_s8, %s814_s9  }
  0x3b PF: > { %170 = sbr.rel (!%p884_p5) target bundleno = 94 (0x5e), region = 24  ;;  %s171_s17 = sand.u32 (%p884_p5), 1, %s810_s15  }
  0x3c   : > { %s173_s19 = sand.u32 (%p884_p5), 1, %s806_s14   ;;  %s570_s26 = sshll.u32 (%p884_p5), %s810_s15, 2 }
  0x3d   : > { %s569_s20 = sshll.u32 (%p884_p5), %s173_s19, 5  ;;  %s177_s27 = ssub.s32 (%p884_p5), 10, %s570_s26 }
  0x3e   : > { %p178_p9 = scmp.lt.s32.totalorder (%p884_p5), %s177_s27, 4  ;;  %s954_s4 = scalar_lea.sflag (%p884_p5), [#allocation6], %s171_s17 }
  0x3f   : > { %s175_s30 = scalar_lea.vmem (%p884_p5), [#allocation5], %s569_s20 }
  0x42   : > { %s1203_s27 = smov (!%p178_p9, %s177_s27), 4 }
  0x43   : > { %s951_s28 = sshll.u32 %s1203_s27, 7 }
  0x44   : > { %s183_s29 = ssub.s32 512, %s951_s28 }
  0x45   : > { %184 = vsyncadd %s954_s4, %s183_s29  ;;  %p573_p10 = scmp.ne.s32.totalorder %s951_s28, 0  ;;  %s600_s5 = sshll.u32 %s810_s15, 9 }
  0x46   : > { %s962_s6 = scalar_lea.hbm %s1187_s1, %s600_s5  ;;  %s190_s7 = sshll.u32 %s175_s30, 4  ;;  %s964_s7 = int_to_ptr.vmem [resolvable:$true] %s190_s7 }
  0x47   : > { %s684_s8 = scalar_lea.hbm %s962_s6, %s951_s28  ;;  %s688_s19 = scalar_lea.hbm %s1187_s1, 1280 }
  0x48   : > { %p685_p13 = scmp.ne.s32.totalorder %s962_s6, %s684_s8  ;;  %p689_p11 = scmp.lt.u32.totalorder %s962_s6, %s1187_s1 }
  0x49   : > { %p690_p12 = scmp.lt.u32.totalorder %s688_s19, %s684_s8  ;;  %p692_p1 = scmp.lt.u32.totalorder %s684_s8, %s962_s6 }
  0x4a   : > { %p686_p2 = pnand %p685_p13, %p573_p10 }
  0x4b   : > { %p691_p0 = por %p690_p12, %p689_p11 }
  0x4c   : > { %p687_p8 = pneg %p686_p2 }
  0x4d   : > { %p693_p3 = por %p692_p1, %p691_p0 }
  0x4f   : > { %p694_p4 = pnand %p693_p3, %p687_p8 }
  0x51   : > { %697 = shalt.err (!%p694_p4)
}
  0x52   : > { %s698_s27 = scalar_lea.vmem %s964_s7, %s951_s28  ;;  %s815_s29 = smov [#allocation5]  }
  0x53   : > { %p699_p7 = scmp.ne.s32.totalorder %s964_s7, %s698_s27  ;;  %s702_s30 = sshll.u32 %s815_s29, 4  ;;  %s703_s30 = int_to_ptr.vmem [resolvable:$false] %s702_s30 }
  0x54   : > { %s704_s5 = scalar_lea.vmem %s703_s30, 1024  ;;  %p705_p2 = scmp.lt.s32.totalorder %s964_s7, %s703_s30 }
  0x55   : > { %p700_p9 = pnand %p699_p7, %p573_p10  ;;  %p706_p11 = scmp.lt.s32.totalorder %s704_s5, %s698_s27 }
  0x57   : > { %p701_p13 = pneg %p700_p9  ;;  %p707_p12 = por %p706_p11, %p705_p2 }
  0x59   : > { %p708_p0 = pnand %p707_p12, %p701_p13 }
  0x5b   : > { %711 = shalt.err (!%p708_p0)
}
  0x5c   : > { %s816_s10 = smov 128   ;;  %s817_s11 = smov 8  }
  0x5d   : > { %196 = dma.hbm_to_vmem [thread:$0]  (%p573_p10), %s962_s6, %s951_s28, %s964_s7, %s954_s4, %s816_s10, %s816_s10, %s817_s11  }
  0x5e PF: > { %199 = sbr.rel (!%p884_p5) target bundleno = 130 (0x82), region = 28  ;;  %s200_s8 = sand.u32 (%p884_p5), 1, %s810_s15  }
  0x5f   : > { %s202_s9 = sand.u32 (%p884_p5), 1, %s806_s14   ;;  %s578_s19 = sshll.u32 (%p884_p5), %s810_s15, 2 }
  0x60   : > { %s601_s17 = smul.u32 (%p884_p5), 96, %s202_s9  ;;  %s206_s20 = ssub.s32 (%p884_p5), 10, %s578_s19 }
  0x61   : > { %p207_p8 = scmp.lt.s32.totalorder (%p884_p5), %s206_s20, 4  ;;  %s999_s29 = scalar_lea.sflag (%p884_p5), [#allocation6], %s200_s8 }
  0x62   : > { %s204_s28 = scalar_lea.vmem (%p884_p5), [#allocation7], %s601_s17 }
  0x65   : > { %s1205_s20 = smov (!%p207_p8, %s206_s20), 4 }
  0x66   : > { %s996_s26 = smul.u32 384, %s1205_s20 }
  0x68   : > { %s212_s27 = ssub.s32 1536, %s996_s26 }
  0x69   : > { %213 = vsyncadd %s999_s29, %s212_s27  ;;  %p581_p5 = scmp.ne.s32.totalorder %s996_s26, 0  ;;  %s602_s22 = smul.u32 1536, %s810_s15 }
  0x6a   : > { %s219_s4 = sshll.u32 %s204_s28, 4  ;;  %s716_s8 = scalar_lea.hbm %s1188_s2, 3840  ;;  %s1009_s4 = int_to_ptr.vmem [resolvable:$true] %s219_s4 }
  0x6b   : > { %s1007_s30 = scalar_lea.hbm %s1188_s2, %s602_s22 }
  0x6c   : > { %s712_s5 = scalar_lea.hbm %s1007_s30, %s996_s26  ;;  %p717_p4 = scmp.lt.u32.totalorder %s1007_s30, %s1188_s2 }
  0x6d   : > { %p713_p10 = scmp.ne.s32.totalorder %s1007_s30, %s712_s5  ;;  %p718_p7 = scmp.lt.u32.totalorder %s716_s8, %s712_s5 }
  0x6e   : > { %p720_p13 = scmp.lt.u32.totalorder %s712_s5, %s1007_s30 }
  0x6f   : > { %p714_p1 = pnand %p713_p10, %p581_p5  ;;  %p719_p9 = por %p718_p7, %p717_p4 }
  0x71   : > { %p715_p3 = pneg %p714_p1  ;;  %p721_p2 = por %p720_p13, %p719_p9 }
  0x73   : > { %p722_p11 = pnand %p721_p2, %p715_p3 }
  0x75   : > { %725 = shalt.err (!%p722_p11)
}
  0x76   : > { %s726_s19 = scalar_lea.vmem %s1009_s4, %s996_s26  ;;  %s818_s20 = smov [#allocation7]  }
  0x77   : > { %p727_p12 = scmp.ne.s32.totalorder %s1009_s4, %s726_s19  ;;  %s730_s27 = sshll.u32 %s818_s20, 4  ;;  %s731_s27 = int_to_ptr.vmem [resolvable:$false] %s730_s27 }
  0x78   : > { %s732_s28 = scalar_lea.vmem %s731_s27, 3072  ;;  %p733_p10 = scmp.lt.s32.totalorder %s1009_s4, %s731_s27 }
  0x79   : > { %p728_p0 = pnand %p727_p12, %p581_p5  ;;  %p734_p1 = scmp.lt.s32.totalorder %s732_s28, %s726_s19 }
  0x7b   : > { %p729_p8 = pneg %p728_p0  ;;  %p735_p4 = por %p734_p1, %p733_p10 }
  0x7d   : > { %p736_p7 = pnand %p735_p4, %p729_p8 }
  0x7f   : > { %739 = shalt.err (!%p736_p7)
}
  0x80   : > { %s819_s22 = smov 384   ;;  %s820_s6 = smov 24  }
  0x81   : > { %225 = dma.hbm_to_vmem [thread:$0]  (%p581_p5), %s1007_s30, %s996_s26, %s1009_s4, %s999_s29, %s819_s22, %s819_s22, %s820_s6  }
  0x82 PF: > { %p585_p3 = scmp.ge.s32.totalorder %s810_s15, 1  ;;  %p227_p9 = scmp.lt.s32.totalorder %s810_s15, 4 }
  0x84   : > { %p228_p13 = pnand %p585_p3, %p227_p9 }
  0x85   : > { %s1039_s7 = sand.u32 (!%p228_p13), 1, %s802_s13  }
  0x86   : > { %231 = sbr.rel (%p228_p13) target bundleno = 315 (0x13b), region = 32  ;;  %s586_s5 = sshll.u32 (!%p228_p13), %s1039_s7, 5 }
  0x87   : > { %s234_s10 = scalar_lea.sflag (!%p228_p13), [#allocation3], %s1039_s7  ;;  %s237_s11 = scalar_lea.vmem (!%p228_p13), [#allocation2], %s586_s5 }
  0x8d   : > { %785 = dma.done.wait (%p888_p6), %s234_s10, 512  }
  0x8e   : > { %787 = vsyncadd (%p888_p6), %s234_s10, 4294966784  ;;  %s242_s26 = sand.u32 1, %s866_s16   ;;  %s1048_s4 = scalar_lea.vmem [#allocation5], %s586_s5 }
  0x8f   : > { %s243_s29 = scalar_lea.sflag [#allocation6], %s242_s26 }
  0x90   : > { %789 = dma.done.wait (%p888_p6), %s243_s29, 2048  }
  0x91   : > { %791 = vsyncadd (%p888_p6), %s243_s29, 4294965248  ;;  %s603_s30 = smul.u32 96, %s1039_s7  ;;  %s821_s17 = smov 64   ;;  %v311_v5 = vld [vmem:[%s237_s11] sm:$0xff]  ;;  %v312_v6 = vld [vmem:[%s237_s11 + $0x8] sm:$0xff]  ;;  %vm375_vm0 = vcmask 523264  }
  0x92   : > { %s604_s9 = smul.u32 160, %s1039_s7  ;;  %v313_v7 = vld [vmem:[%s237_s11 + $0x10] sm:$0xff]  ;;  %v314_v8 = vld [vmem:[%s237_s11 + $0x18] sm:$0xff]  ;;  %v315_v10 = vld [vmem:[%s1048_s4] sm:$0xff]  ;;  %vm404_vm1 = vcmask 883712   ;;  %s422_s19 = scalar_lea.sflag [#allocation4], %s1039_s7 }
  0x93   : > { %s1055_s8 = scalar_lea.vmem [#allocation7], %s603_s30  ;;  %v316_v11 = vld [vmem:[%s1048_s4 + $0x8] sm:$0xff]  ;;  %v319_v12 = vunpack.c.l.bf16 %v315_v10  ;;  %v317_v14 = vld [vmem:[%s1048_s4 + $0x10] sm:$0xff]  ;;  %v318_v15 = vld [vmem:[%s1048_s4 + $0x18] sm:$0xff]  ;;  %v320_v24 = vunpack.c.h.bf16 %v315_v10  ;;  %p1194_p6 = scmp.ne.s32.totalorder %s1192_s24, 0 }
  0x94   : > { %v329_v0 = vld [vmem:[%s1055_s8 + $0x10] sm:$0xff]  ;;  %v327_v1 = vld [vmem:[%s1055_s8] sm:$0xff]  ;;  %v330_v2 = vld [vmem:[%s1055_s8 + $0x18] sm:$0xff]  ;;  %s1067_s23 = scalar_lea.vmem [#allocation8], %s604_s9  ;;  %v321_v13 = vunpack.c.l.bf16 %v316_v11  ;;  %v323_v16 = vunpack.c.l.bf16 %v317_v14  ;;  %v325_v17 = vunpack.c.l.bf16 %v318_v15  ;;  %v322_v28 = vunpack.c.h.bf16 %v316_v11  ;;  %s588_s20 = sshll.u32 (%p1194_p6), %s866_s16, 2 }
  0x95   : > { %355 = vrot.lane.b32.xlu1 %v329_v0, %s821_s17  ;;  %351 = vrot.lane.b32.xlu0 %v327_v1, %s821_s17  ;;  %v328_v3 = vld [vmem:[%s1055_s8 + $0x8] sm:$0xff]  ;;  %400 = vst [vmem:[%s1067_s23] sm:$0xff] %v311_v5  ;;  %v324_v38 = vunpack.c.h.bf16 %v317_v14  ;;  %v326_v43 = vunpack.c.h.bf16 %v318_v15  ;;  %s430_s27 = ssub.s32 (%p1194_p6), 10, %s588_s20 }
  0x96   : > { %v332_v4 = vld [vmem:[%s1055_s8 + $0x28] sm:$0xff]  ;;  %406 = vst [vmem:[%s1067_s23 + $0x28] sm:$0xff] %v312_v6  ;;  %v331_v9 = vld [vmem:[%s1055_s8 + $0x20] sm:$0xff]  ;;  %411 = vst [vmem:[%s1067_s23 + $0x50] sm:$0xff] %v313_v7  ;;  %p431_p5 = scmp.lt.s32.totalorder (%p1194_p6), %s430_s27, 4 }
  0x97   : > { %416 = vst [vmem:[%s1067_s23 + $0x78] sm:$0xff] %v314_v8  ;;  %401 = vst [vmem:[%s1067_s23 + $0x8] sm:$0xff] %v319_v12  ;;  %v334_v18 = vld [vmem:[%s1055_s8 + $0x38] sm:$0xff]  ;;  %v333_v19 = vld [vmem:[%s1055_s8 + $0x30] sm:$0xff] }
  0x98   : > { %407 = vst [vmem:[%s1067_s23 + $0x30] sm:$0xff] %v321_v13  ;;  %412 = vst [vmem:[%s1067_s23 + $0x58] sm:$0xff] %v323_v16  ;;  %v336_v20 = vld [vmem:[%s1055_s8 + $0x48] sm:$0xff]  ;;  %v335_v21 = vld [vmem:[%s1055_s8 + $0x40] sm:$0xff] }
  0x99   : > { %357 = vrot.lane.b32.xlu1 %v330_v2, %s821_s17  ;;  %353 = vrot.lane.b32.xlu0 %v328_v3, %s821_s17  ;;  %417 = vst [vmem:[%s1067_s23 + $0x80] sm:$0xff] %v325_v17  ;;  %v338_v22 = vld [vmem:[%s1055_s8 + $0x58] sm:$0xff] }
  0x9a   : > { %v337_v23 = vld [vmem:[%s1055_s8 + $0x50] sm:$0xff] }
  0x9d   : > { %361 = vrot.lane.b32.xlu1 %v332_v4, %s821_s17  ;;  %359 = vrot.lane.b32.xlu0 %v331_v9, %s821_s17 }
  0xa1   : > { %365 = vrot.lane.b32.xlu1 %v334_v18, %s821_s17  ;;  %363 = vrot.lane.b32.xlu0 %v333_v19, %s821_s17 }
  0xa5   : > { %369 = vrot.lane.b32.xlu1 %v336_v20, %s821_s17  ;;  %367 = vrot.lane.b32.xlu0 %v335_v21, %s821_s17 }
  0xa9   : > { %373 = vrot.lane.b32.xlu1 %v338_v22, %s821_s17  ;;  %371 = vrot.lane.b32.xlu0 %v337_v23, %s821_s17 }
 0x107   : > { %v356_v25 = vpop.permute.xlu1 %355  ;;  %v352_v26 = vpop.permute.xlu0 %351 }
 0x108   : > { %v396_v27 = vsel %vm375_vm0, %v320_v24, %v352_v26 }
 0x109   : > { %402 = vst [vmem:[%s1067_s23 + $0x10] sm:$0xff] %v396_v27 }
 0x10b   : > { %v358_v29 = vpop.permute.xlu1 %357  ;;  %v354_v30 = vpop.permute.xlu0 %353 }
 0x10c   : > { %v397_v31 = vsel %vm375_vm0, %v322_v28, %v358_v29  ;;  %v376_v32 = vsel %vm375_vm0, %v352_v26, %v354_v30  ;;  %v377_v33 = vsel %vm375_vm0, %v354_v30, %v356_v25 }
 0x10d   : > { %408 = vst [vmem:[%s1067_s23 + $0x38] sm:$0xff] %v397_v31  ;;  %403 = vst [vmem:[%s1067_s23 + $0x18] sm:$0xff] %v376_v32 }
 0x10e   : > { %405 = vst.msk [vmem:[%s1067_s23 + $0x20] sm:$0xff] %vm404_vm1, %v377_v33 }
 0x10f   : > { %v362_v34 = vpop.permute.xlu1 %361  ;;  %v360_v35 = vpop.permute.xlu0 %359 }
 0x110   : > { %v378_v36 = vsel %vm375_vm0, %v358_v29, %v360_v35  ;;  %v379_v37 = vsel %vm375_vm0, %v360_v35, %v362_v34 }
 0x111   : > { %409 = vst [vmem:[%s1067_s23 + $0x40] sm:$0xff] %v378_v36  ;;  %410 = vst.msk [vmem:[%s1067_s23 + $0x48] sm:$0xff] %vm404_vm1, %v379_v37 }
 0x113   : > { %v366_v39 = vpop.permute.xlu1 %365  ;;  %v364_v40 = vpop.permute.xlu0 %363 }
 0x114   : > { %v380_v41 = vsel %vm375_vm0, %v364_v40, %v366_v39  ;;  %v398_v42 = vsel %vm375_vm0, %v324_v38, %v364_v40 }
 0x115   : > { %413 = vst [vmem:[%s1067_s23 + $0x60] sm:$0xff] %v398_v42  ;;  %414 = vst [vmem:[%s1067_s23 + $0x68] sm:$0xff] %v380_v41 }
 0x117   : > { %v370_v44 = vpop.permute.xlu1 %369  ;;  %v368_v45 = vpop.permute.xlu0 %367  ;;  %428 = sbr.rel (!%p1194_p6) target bundleno = 315 (0x13b), region = 48 }
 0x118   : > { %v399_v46 = vsel %vm375_vm0, %v326_v43, %v370_v44  ;;  %v381_v47 = vsel %vm375_vm0, %v366_v39, %v368_v45 }
 0x119   : > { %418 = vst [vmem:[%s1067_s23 + $0x88] sm:$0xff] %v399_v46  ;;  %415 = vst.msk [vmem:[%s1067_s23 + $0x70] sm:$0xff] %vm404_vm1, %v381_v47 }
 0x11b   : > { %v374_v48 = vpop.permute.xlu1 %373  ;;  %v372_v49 = vpop.permute.xlu0 %371 }
 0x11c   : > { %v382_v50 = vsel %vm375_vm0, %v370_v44, %v372_v49  ;;  %v383_v51 = vsel %vm375_vm0, %v372_v49, %v374_v48 }
 0x11d   : > { %419 = vst [vmem:[%s1067_s23 + $0x90] sm:$0xff] %v382_v50  ;;  %420 = vst.msk [vmem:[%s1067_s23 + $0x98] sm:$0xff] %vm404_vm1, %v383_v51 }
 0x11e   : > { %s1207_s27 = smov (!%p431_p5, %s430_s27), 4 }
 0x11f   : > { %s1128_s28 = smul.u32 640, %s1207_s27 }
 0x121   : > { %s436_s22 = ssub.s32 2560, %s1128_s28 }
 0x122   : > { %437 = vsyncadd %s422_s19, %s436_s22  ;;  %p591_p2 = scmp.ne.s32.totalorder %s1128_s28, 0  ;;  %s605_s24 = smul.u32 2560, %s866_s16 }
 0x123   : > { %s443_s6 = sshll.u32 %s1067_s23, 4  ;;  %s822_s29 = smov [#allocation8]   ;;  %s1141_s6 = int_to_ptr.vmem [resolvable:$true] %s443_s6 }
 0x124   : > { %s1139_s11 = scalar_lea.hbm %s1189_s3, %s605_s24  ;;  %s740_s26 = scalar_lea.vmem %s1141_s6, %s1128_s28 }
 0x125   : > { %p741_p11 = scmp.ne.s32.totalorder %s1141_s6, %s740_s26  ;;  %s744_s4 = sshll.u32 %s822_s29, 4  ;;  %s745_s4 = int_to_ptr.vmem [resolvable:$false] %s744_s4 }
 0x126   : > { %s746_s16 = scalar_lea.vmem %s745_s4, 5120  ;;  %p747_p8 = scmp.lt.s32.totalorder %s1141_s6, %s745_s4 }
 0x127   : > { %p742_p12 = pnand %p741_p11, %p591_p2  ;;  %p748_p10 = scmp.lt.s32.totalorder %s746_s16, %s740_s26 }
 0x129   : > { %p743_p0 = pneg %p742_p12  ;;  %p749_p1 = por %p748_p10, %p747_p8 }
 0x12b   : > { %p750_p4 = pnand %p749_p1, %p743_p0 }
 0x12d   : > { %753 = shalt.err (!%p750_p4)
}
 0x12e   : > { %s754_s30 = scalar_lea.hbm %s1139_s11, %s1128_s28  ;;  %s758_s17 = scalar_lea.hbm %s1189_s3, 6400 }
 0x12f   : > { %p755_p7 = scmp.ne.s32.totalorder %s1139_s11, %s754_s30  ;;  %p759_p13 = scmp.lt.u32.totalorder %s1139_s11, %s1189_s3 }
 0x130   : > { %p760_p6 = scmp.lt.u32.totalorder %s758_s17, %s754_s30  ;;  %p762_p11 = scmp.lt.u32.totalorder %s754_s30, %s1139_s11 }
 0x131   : > { %p756_p3 = pnand %p755_p7, %p591_p2 }
 0x132   : > { %p761_p5 = por %p760_p6, %p759_p13 }
 0x133   : > { %p757_p9 = pneg %p756_p3 }
 0x134   : > { %p763_p12 = por %p762_p11, %p761_p5 }
 0x136   : > { %p764_p0 = pnand %p763_p12, %p757_p9 }
 0x138   : > { %767 = shalt.err (!%p764_p0)
}
 0x139   : > { %s823_s27 = smov 640   ;;  %s824_s22 = smov 40  }
 0x13a   : > { %449 = dma.vmem_to_hbm [thread:$0]  (%p591_p2), %s1141_s6, %s1128_s28, %s1139_s11, %s422_s19, %s823_s27, %s823_s27, %s824_s22  }
 0x13b PF: > { %p614_p8 = scmp.ge.s32.totalorder %s810_s15, 2  ;;  %s458_s24 = sand.u32 1, %s798_s12  }
 0x13c   : > { %p1195_p10 = scmp.ne.s32.totalorder %s1193_s25, 0  ;;  %s459_s5 = scalar_lea.sflag [#allocation4], %s458_s24 }
 0x13e   : > { %p611_p1 = pnand %p614_p8, %p1195_p10 }
 0x140   : > { %793 = dma.done.wait (!%p611_p1), %s459_s5, 2560  }
 0x141   : > { %795 = vsyncadd (!%p611_p1), %s459_s5, 4294964736  ;;  %p19_p4 = scmp.ge.s32.totalorder %s870_s18, 5   ;;  %s1196_s12 = smov %s802_s13 }
 0x142   : > { %s1197_s13 = smov %s806_s14  ;;  %s1198_s14 = smov %s882_s21 }
 0x143   : > { %s1199_s15 = smov %s870_s18  ;;  %21 = sbr.rel (!%p19_p4) target bundleno = 7 (0x7), region = 101 }
 0x14a   :  { %464 = vsyncpa [#allocation3], 1 }
 0x14b   :  { %466 = vsyncpa [#allocation3 + $0x1], 1 }
 0x14c   :  { %467 = vsyncpa [#allocation6], 1 }
 0x14d   :  { %469 = vsyncpa [#allocation6 + $0x1], 1 }
 0x14e   :  { %470 = vsyncpa [#allocation4], 1 }
 0x14f   :  { %472 = vsyncpa [#allocation4 + $0x1], 1 }

</bundles_post_ra>
